<compile_context>
chip_gen: v7x
topology: tpu7x:2x2x1
jax: 0.10.0
libtpu: 0.0.40
codegen_flags: <defaults>
</compile_context>

<pallas_src>
import functools

import jax
import jax.numpy as jnp
from jax import lax
from jax.experimental import pallas as pl
from jax.experimental.pallas import tpu as pltpu


def _phase_cols(x_val, cols_ref, *, p, K, P, Cin):
    """Fill cols_ref (K*Cin, TLh) for output phase p from the phase-split tile.

    x_val : (P*Cin, TLph) value; row q*Cin+ci holds x_pad[ci, m*P + q] (tile-local).
    cols_ref[k*Cin+ci, j] must equal x_pad[ci, j*P + p + k]  (tile-local index).
    Only unit-offset lane slices + sublane-offset scratch writes (no strided ops).
    """
    TLh = cols_ref.shape[1]
    for k in range(K):                     # static unroll (K is tiny, e.g. 3)
        a = p + k
        q, d = a % P, a // P               # source phase / lane offset of tap k
        cols_ref[k * Cin:(k + 1) * Cin, :] = (
            x_val[q * Cin:(q + 1) * Cin, d:d + TLh].astype(cols_ref.dtype))


def conv_stats_kernel(x_ref, w_ref, sum_ref, ssq_ref, cols_ref, *, K, P,
                      compute_dtype):
    """Pass 1: conv (bias-free) + global per-channel sum / sum-of-squares."""
    @pl.when(pl.program_id(0) == 0)
    def _init():
        sum_ref[...] = jnp.zeros_like(sum_ref)
        ssq_ref[...] = jnp.zeros_like(ssq_ref)

    Cin = x_ref.shape[1] // P
    xv = x_ref[0]                                            # (P*Cin, TLph)
    w = w_ref[...].astype(compute_dtype)                     # (Cout, K*Cin)
    s = jnp.zeros(sum_ref.shape, jnp.float32)
    sq = jnp.zeros(ssq_ref.shape, jnp.float32)
    for p in range(P):                                       # static unroll (P = pooling)
        _phase_cols(xv, cols_ref, p=p, K=K, P=P, Cin=Cin)
        y = jnp.dot(w, cols_ref[...], preferred_element_type=jnp.float32)
        s = s + jnp.sum(y, axis=1, keepdims=True)            # (Cout, 1)
        sq = sq + jnp.sum(y * y, axis=1, keepdims=True)
    sum_ref[...] += s
    ssq_ref[...] += sq


def conv_bn_relu_pool_kernel(x_ref, w_ref, scale_ref, shift_ref, o_ref,
                             cols_ref, *, K, P, compute_dtype):
    """Pass 2: conv (recomputed), folded BatchNorm, ReLU, polyphase MaxPool."""
    Cin = x_ref.shape[1] // P
    xv = x_ref[0]
    w = w_ref[...].astype(compute_dtype)
    scale = scale_ref[...]                                   # (Cout, 1)
    shift = shift_ref[...]                                   # (Cout, 1)
    out = None
    for p in range(P):
        _phase_cols(xv, cols_ref, p=p, K=K, P=P, Cin=Cin)
        y = jnp.dot(w, cols_ref[...], preferred_element_type=jnp.float32)
        y = jnp.maximum(y * scale + shift, 0.0)              # folded BN + ReLU
        out = y if p == 0 else jnp.maximum(out, y)           # MaxPool over phases
    o_ref[0] = out.astype(o_ref.dtype)                       # lane-dense store


def _pick_tile_len(L, pooling, max_rows):
    """Largest length tile dividing L, multiple of `pooling`, at most max_rows."""
    best = pooling
    for t in range(pooling, min(L, max_rows) + 1, pooling):
        if L % t == 0:
            best = t
    return best


def conv_1d_forward(x_ncl, weight, bias, gamma, beta, *, pooling=2, eps=1e-5,
                    max_tile_rows=4096, compute_dtype=jnp.float32):
    """Forward of the PyTorch Conv_1d module.

    x_ncl : (N, C_in, L)   weight: (C_out, C_in, K)   bias/gamma/beta: (C_out,)
    returns (N, C_out, L // pooling)
    """
    N, Cin, L = x_ncl.shape
    Cout, Cin_w, K = weight.shape
    assert Cin_w == Cin
    assert K % 2 == 1, "same-padding halo assumes odd kernel width"
    P = int(pooling)
    assert P >= 1 and L % P == 0, "MaxPool1d here needs L divisible by pooling"
    # TODO(synk): even-K / ragged-L handling (PyTorch output length would differ).

    pad = K // 2
    TL = _pick_tile_len(L, P, max_tile_rows)   # conv output rows per length tile
    nLt = L // TL
    num_tiles = N * nLt
    TLp = TL + K - 1                            # haloed tile length
    TLh = TL // P                               # pooled outputs per tile
    dmax = (P + K - 2) // P                     # per-phase halo entries
    TLph = TLh + dmax                           # per-phase haloed tile length
    M = N * L                                   # rows entering BN statistics

    # Conv bias is a per-channel constant -> cancels exactly under training-mode
    # BatchNorm ((z+b) - mean(z+b) == z - mean(z)); it never reaches the output.
    del bias

    # ---------------- wrapper layout plumbing (plain JAX glue) ----------------
    x = x_ncl.astype(jnp.float32)                              # (N, Cin, L)
    x_pad = jnp.pad(x, ((0, 0), (0, 0), (pad, pad)))           # (N, Cin, L+2p)
    # Haloed, otherwise non-overlapping length tiles (only 2*pad rows duplicated).
    x_tiles = jnp.stack(
        [x_pad[:, :, t * TL: t * TL + TLp] for t in range(nLt)],
        axis=1).reshape(num_tiles, Cin, TLp)
    # Polyphase deinterleave along length: row q*Cin+ci, col m  <->  tile[ci, m*P+q].
    phases = []
    for q in range(P):
        ph = x_tiles[:, :, q::P]                               # (num_tiles, Cin, *)
        plen = ph.shape[-1]
        if plen < TLph:
            ph = jnp.pad(ph, ((0, 0), (0, 0), (0, TLph - plen)))
        else:
            ph = ph[:, :, :TLph]
        phases.append(ph)
    x_ph = jnp.concatenate(phases, axis=1)                     # (num_tiles, P*Cin, TLph)
    # Fold the kernel width into the contraction dim: (Cout, K*Cin).
    w2 = jnp.transpose(weight, (0, 2, 1)).reshape(Cout, K * Cin).astype(jnp.float32)

    vmem_limit = 32 * 1024 * 1024        # within v7x's 64 MiB phys; fine on v5e/v6e
    x_spec = pl.BlockSpec((1, P * Cin, TLph), lambda i: (i, 0, 0))
    w_spec = pl.BlockSpec((Cout, K * Cin), lambda i: (0, 0))
    ch_spec = pl.BlockSpec((Cout, 1), lambda i: (0, 0))

    # -------- pass 1: conv + global per-channel sum / sumsq (BN statistics) --------
    sums, ssqs = pl.pallas_call(
        functools.partial(conv_stats_kernel, K=K, P=P, compute_dtype=compute_dtype),
        out_shape=(jax.ShapeDtypeStruct((Cout, 1), jnp.float32),
                   jax.ShapeDtypeStruct((Cout, 1), jnp.float32)),
        grid=(num_tiles,),
        in_specs=[x_spec, w_spec],
        out_specs=(ch_spec, ch_spec),
        scratch_shapes=[pltpu.VMEM((K * Cin, TLh), compute_dtype)],
        compiler_params=pltpu.CompilerParams(
            dimension_semantics=("arbitrary",),        # cross-tile accumulators
            vmem_limit_bytes=vmem_limit),
    )(x_ph, w2)

    # Fold BN statistics into per-channel scale/shift (tiny, plain JAX).
    mean = sums[:, 0] / M
    var = jnp.maximum(ssqs[:, 0] / M - mean * mean, 0.0)   # biased var (training mode)
    invstd = lax.rsqrt(var + eps)
    g = gamma.astype(jnp.float32)
    scale = (g * invstd).reshape(Cout, 1)
    shift = (beta.astype(jnp.float32) - g * invstd * mean).reshape(Cout, 1)

    # -------- pass 2: conv (recomputed) + BN + ReLU + polyphase MaxPool --------
    out_tiles = pl.pallas_call(
        functools.partial(conv_bn_relu_pool_kernel, K=K, P=P,
                          compute_dtype=compute_dtype),
        out_shape=jax.ShapeDtypeStruct((num_tiles, Cout, TLh), x_ncl.dtype),
        grid=(num_tiles,),
        in_specs=[x_spec, w_spec, ch_spec, ch_spec],
        out_specs=pl.BlockSpec((1, Cout, TLh), lambda i: (i, 0, 0)),
        scratch_shapes=[pltpu.VMEM((K * Cin, TLh), compute_dtype)],
        compiler_params=pltpu.CompilerParams(
            dimension_semantics=("parallel",),         # v7x: shard tiles over 2 TCs
            vmem_limit_bytes=vmem_limit),
    )(x_ph, w2, scale, shift)

    # (N*nLt, Cout, TL//P) -> (N, C_out, L//P); trivial reshape when nLt == 1.
    out = out_tiles.reshape(N, nLt, Cout, TLh)
    return jnp.transpose(out, (0, 2, 1, 3)).reshape(N, Cout, L // P)


def reference_forward(x, weight, bias, gamma, beta, *, pooling=2, eps=1e-5):
    """Plain-JAX reference with identical semantics (for the correctness check)."""
    conv = lax.conv_general_dilated(
        x, weight, window_strides=(1,),
        padding=[(weight.shape[2] // 2, weight.shape[2] // 2)],
        dimension_numbers=("NCH", "OIH", "NCH"))
    conv = conv + bias[None, :, None]
    mean = jnp.mean(conv, axis=(0, 2), keepdims=True)
    var = jnp.mean((conv - mean) ** 2, axis=(0, 2), keepdims=True)
    y = (conv - mean) * lax.rsqrt(var + eps)
    y = y * gamma[None, :, None] + beta[None, :, None]
    y = jnp.maximum(y, 0.0)
    N, C, L = y.shape
    return y.reshape(N, C, L // pooling, pooling).max(axis=-1)


if __name__ == "__main__":
    key = jax.random.PRNGKey(0)
    kx, kw, kb, kg, kbe = jax.random.split(key, 5)

    N, Cin, Cout, L, K = 2, 4, 8, 16, 3
    x = jax.random.normal(kx, (N, Cin, L), jnp.float32)

    # deterministic synthetic parameters (shapes follow torch.nn.Conv1d / BatchNorm1d)
    bound = 1.0 / (Cin * K) ** 0.5
    weight = jax.random.uniform(kw, (Cout, Cin, K), jnp.float32, -bound, bound)
    bias = jax.random.uniform(kb, (Cout,), jnp.float32, -bound, bound)
    gamma = 1.0 + 0.1 * jax.random.normal(kg, (Cout,), jnp.float32)
    beta = 0.1 * jax.random.normal(kbe, (Cout,), jnp.float32)

    out = jax.block_until_ready(conv_1d_forward(x, weight, bias, gamma, beta))
    ref = reference_forward(x, weight, bias, gamma, beta)

    assert out.shape == (N, Cout, L // 2), out.shape
    assert jnp.allclose(out, ref, atol=1e-4, rtol=1e-4), float(
        jnp.max(jnp.abs(out - ref)))
    print("KERNEL_OK")
</pallas_src>

<mosaic_0001>
module attributes {stable_mosaic.version = 11 : i64} {
  func.func @conv_stats_kernel(%arg0: i32, %arg1: memref<1x8x9xf32, #tpu.memory_space<vmem>>, %arg2: memref<8x12xf32, #tpu.memory_space<vmem>>, %arg3: memref<8x1xf32, #tpu.memory_space<vmem>>, %arg4: memref<8x1xf32, #tpu.memory_space<vmem>>, %arg5: memref<12x8xf32, #tpu.memory_space<vmem>>) attributes {dimension_semantics = [#tpu.dimension_semantics<arbitrary>], iteration_bounds = array<i64: 2>, scalar_prefetch = 0 : i64, scratch_operands = 1 : i64, tpu.core_type = #tpu.core_type<tc>, window_params = [{transform_indices = @transform_0, window_bounds = array<i64: 1, 8, 9>}, {pipeline_mode = #tpu.pipeline_mode<synchronous>, transform_indices = @transform_1, window_bounds = array<i64: 8, 12>}, {pipeline_mode = #tpu.pipeline_mode<synchronous>, transform_indices = @transform_2, window_bounds = array<i64: 8, 1>}, {pipeline_mode = #tpu.pipeline_mode<synchronous>, transform_indices = @transform_3, window_bounds = array<i64: 8, 1>}]} {
    %c0_i32 = arith.constant 0 : i32
    %0 = arith.cmpi eq, %arg0, %c0_i32 : i32
    %1 = arith.extui %0 : i1 to i32
    %c0_i32_0 = arith.constant 0 : i32
    %2 = arith.cmpi ne, %1, %c0_i32_0 : i32
    scf.if %2 {
      %cst_34 = arith.constant 0.000000e+00 : f32
      %44 = vector.broadcast %cst_34 : f32 to vector<8x1xf32>
      %c0_35 = arith.constant 0 : index
      %c0_36 = arith.constant 0 : index
      %45 = vector.load %arg3[%c0_35, %c0_36] : memref<8x1xf32, #tpu.memory_space<vmem>>, vector<8x1xf32>
      tpu.vector_store %arg3[%c0_35, %c0_36], %44 {strides = array<i32>} : memref<8x1xf32, #tpu.memory_space<vmem>>, vector<8x1xf32>,
      %cst_37 = arith.constant 0.000000e+00 : f32
      %46 = vector.broadcast %cst_37 : f32 to vector<8x1xf32>
      %c0_38 = arith.constant 0 : index
      %c0_39 = arith.constant 0 : index
      %47 = vector.load %arg4[%c0_38, %c0_39] : memref<8x1xf32, #tpu.memory_space<vmem>>, vector<8x1xf32>
      tpu.vector_store %arg4[%c0_38, %c0_39], %46 {strides = array<i32>} : memref<8x1xf32, #tpu.memory_space<vmem>>, vector<8x1xf32>,
    } else {
    }
    %c0 = arith.constant 0 : index
    %c0_1 = arith.constant 0 : index
    %c0_2 = arith.constant 0 : index
    %3 = vector.load %arg1[%c0, %c0_1, %c0_2] : memref<1x8x9xf32, #tpu.memory_space<vmem>>, vector<1x8x9xf32>
    %4 = vector.shape_cast %3 : vector<1x8x9xf32> to vector<8x9xf32>
    %c0_3 = arith.constant 0 : index
    %c0_4 = arith.constant 0 : index
    %5 = vector.load %arg2[%c0_3, %c0_4] : memref<8x12xf32, #tpu.memory_space<vmem>>, vector<8x12xf32>
    %cst = arith.constant 0.000000e+00 : f32
    %6 = vector.broadcast %cst : f32 to vector<8x1xf32>
    %cst_5 = arith.constant 0.000000e+00 : f32
    %7 = vector.broadcast %cst_5 : f32 to vector<8x1xf32>
    %8 = vector.extract_strided_slice %4 {offsets = [0, 0], sizes = [4, 8], strides = [1, 1]} : vector<8x9xf32> to vector<4x8xf32>
    %c0_6 = arith.constant 0 : index
    %c0_7 = arith.constant 0 : index
    %9 = vector.load %arg5[%c0_6, %c0_7] : memref<12x8xf32, #tpu.memory_space<vmem>>, vector<4x8xf32>
    tpu.vector_store %arg5[%c0_6, %c0_7], %8 {strides = array<i32>} : memref<12x8xf32, #tpu.memory_space<vmem>>, vector<4x8xf32>,
    %10 = vector.extract_strided_slice %4 {offsets = [4, 0], sizes = [4, 8], strides = [1, 1]} : vector<8x9xf32> to vector<4x8xf32>
    %c4 = arith.constant 4 : index
    %c0_8 = arith.constant 0 : index
    %11 = vector.load %arg5[%c4, %c0_8] : memref<12x8xf32, #tpu.memory_space<vmem>>, vector<4x8xf32>
    tpu.vector_store %arg5[%c4, %c0_8], %10 {strides = array<i32>} : memref<12x8xf32, #tpu.memory_space<vmem>>, vector<4x8xf32>,
    %12 = vector.extract_strided_slice %4 {offsets = [0, 1], sizes = [4, 8], strides = [1, 1]} : vector<8x9xf32> to vector<4x8xf32>
    %c8 = arith.constant 8 : index
    %c0_9 = arith.constant 0 : index
    %13 = vector.load %arg5[%c8, %c0_9] : memref<12x8xf32, #tpu.memory_space<vmem>>, vector<4x8xf32>
    tpu.vector_store %arg5[%c8, %c0_9], %12 {strides = array<i32>} : memref<12x8xf32, #tpu.memory_space<vmem>>, vector<4x8xf32>,
    %c0_10 = arith.constant 0 : index
    %c0_11 = arith.constant 0 : index
    %14 = vector.load %arg5[%c0_10, %c0_11] : memref<12x8xf32, #tpu.memory_space<vmem>>, vector<12x8xf32>
    %cst_12 = arith.constant dense<0.000000e+00> : vector<8x8xf32>
    %15 = tpu.matmul %5, %14, %cst_12 {dimension_numbers = #tpu.dot_dimension_numbers<[1], [0], [0], [1], [0, 0, 1, 1], [], []>} : vector<8x12xf32>, vector<12x8xf32>, vector<8x8xf32> -> vector<8x8xf32>
    %cst_13 = arith.constant dense<0.000000e+00> : vector<8xf32>
    %16 = vector.multi_reduction <add>, %15, %cst_13 [1] : vector<8x8xf32> to vector<8xf32>
    %17 = vector.shape_cast %16 : vector<8xf32> to vector<8x1xf32>
    %18 = arith.addf %6, %17 : vector<8x1xf32>
    %19 = arith.mulf %15, %15 : vector<8x8xf32>
    %cst_14 = arith.constant dense<0.000000e+00> : vector<8xf32>
    %20 = vector.multi_reduction <add>, %19, %cst_14 [1] : vector<8x8xf32> to vector<8xf32>
    %21 = vector.shape_cast %20 : vector<8xf32> to vector<8x1xf32>
    %22 = arith.addf %7, %21 : vector<8x1xf32>
    %23 = vector.extract_strided_slice %4 {offsets = [4, 0], sizes = [4, 8], strides = [1, 1]} : vector<8x9xf32> to vector<4x8xf32>
    %c0_15 = arith.constant 0 : index
    %c0_16 = arith.constant 0 : index
    %24 = vector.load %arg5[%c0_15, %c0_16] : memref<12x8xf32, #tpu.memory_space<vmem>>, vector<4x8xf32>
    tpu.vector_store %arg5[%c0_15, %c0_16], %23 {strides = array<i32>} : memref<12x8xf32, #tpu.memory_space<vmem>>, vector<4x8xf32>,
    %25 = vector.extract_strided_slice %4 {offsets = [0, 1], sizes = [4, 8], strides = [1, 1]} : vector<8x9xf32> to vector<4x8xf32>
    %c4_17 = arith.constant 4 : index
    %c0_18 = arith.constant 0 : index
    %26 = vector.load %arg5[%c4_17, %c0_18] : memref<12x8xf32, #tpu.memory_space<vmem>>, vector<4x8xf32>
    tpu.vector_store %arg5[%c4_17, %c0_18], %25 {strides = array<i32>} : memref<12x8xf32, #tpu.memory_space<vmem>>, vector<4x8xf32>,
    %27 = vector.extract_strided_slice %4 {offsets = [4, 1], sizes = [4, 8], strides = [1, 1]} : vector<8x9xf32> to vector<4x8xf32>
    %c8_19 = arith.constant 8 : index
    %c0_20 = arith.constant 0 : index
    %28 = vector.load %arg5[%c8_19, %c0_20] : memref<12x8xf32, #tpu.memory_space<vmem>>, vector<4x8xf32>
    tpu.vector_store %arg5[%c8_19, %c0_20], %27 {strides = array<i32>} : memref<12x8xf32, #tpu.memory_space<vmem>>, vector<4x8xf32>,
    %c0_21 = arith.constant 0 : index
    %c0_22 = arith.constant 0 : index
    %29 = vector.load %arg5[%c0_21, %c0_22] : memref<12x8xf32, #tpu.memory_space<vmem>>, vector<12x8xf32>
    %cst_23 = arith.constant dense<0.000000e+00> : vector<8x8xf32>
    %30 = tpu.matmul %5, %29, %cst_23 {dimension_numbers = #tpu.dot_dimension_numbers<[1], [0], [0], [1], [0, 0, 1, 1], [], []>} : vector<8x12xf32>, vector<12x8xf32>, vector<8x8xf32> -> vector<8x8xf32>
    %cst_24 = arith.constant dense<0.000000e+00> : vector<8xf32>
    %31 = vector.multi_reduction <add>, %30, %cst_24 [1] : vector<8x8xf32> to vector<8xf32>
    %32 = vector.shape_cast %31 : vector<8xf32> to vector<8x1xf32>
    %33 = arith.addf %18, %32 : vector<8x1xf32>
    %34 = arith.mulf %30, %30 : vector<8x8xf32>
    %cst_25 = arith.constant dense<0.000000e+00> : vector<8xf32>
    %35 = vector.multi_reduction <add>, %34, %cst_25 [1] : vector<8x8xf32> to vector<8xf32>
    %36 = vector.shape_cast %35 : vector<8xf32> to vector<8x1xf32>
    %37 = arith.addf %22, %36 : vector<8x1xf32>
    %c0_26 = arith.constant 0 : index
    %c0_27 = arith.constant 0 : index
    %38 = vector.load %arg3[%c0_26, %c0_27] : memref<8x1xf32, #tpu.memory_space<vmem>>, vector<8x1xf32>
    %39 = arith.addf %38, %33 : vector<8x1xf32>
    %c0_28 = arith.constant 0 : index
    %c0_29 = arith.constant 0 : index
    %40 = vector.load %arg3[%c0_28, %c0_29] : memref<8x1xf32, #tpu.memory_space<vmem>>, vector<8x1xf32>
    tpu.vector_store %arg3[%c0_28, %c0_29], %39 {strides = array<i32>} : memref<8x1xf32, #tpu.memory_space<vmem>>, vector<8x1xf32>,
    %c0_30 = arith.constant 0 : index
    %c0_31 = arith.constant 0 : index
    %41 = vector.load %arg4[%c0_30, %c0_31] : memref<8x1xf32, #tpu.memory_space<vmem>>, vector<8x1xf32>
    %42 = arith.addf %41, %37 : vector<8x1xf32>
    %c0_32 = arith.constant 0 : index
    %c0_33 = arith.constant 0 : index
    %43 = vector.load %arg4[%c0_32, %c0_33] : memref<8x1xf32, #tpu.memory_space<vmem>>, vector<8x1xf32>
    tpu.vector_store %arg4[%c0_32, %c0_33], %42 {strides = array<i32>} : memref<8x1xf32, #tpu.memory_space<vmem>>, vector<8x1xf32>,
    return
  }
  func.func @transform_0(%arg0: i32) -> (i32, i32, i32) {
    %c0_i32 = arith.constant 0 : i32
    %c0_i32_0 = arith.constant 0 : i32
    %c0_i32_1 = arith.constant 0 : i32
    return %arg0, %c0_i32, %c0_i32_0 : i32, i32, i32
  }
  func.func @transform_1(%arg0: i32) -> (i32, i32) {
    %c0_i32 = arith.constant 0 : i32
    %c0_i32_0 = arith.constant 0 : i32
    %c0_i32_1 = arith.constant 0 : i32
    return %c0_i32, %c0_i32_0 : i32, i32
  }
  func.func @transform_2(%arg0: i32) -> (i32, i32) {
    %c0_i32 = arith.constant 0 : i32
    %c0_i32_0 = arith.constant 0 : i32
    %c0_i32_1 = arith.constant 0 : i32
    return %c0_i32, %c0_i32_0 : i32, i32
  }
  func.func @transform_3(%arg0: i32) -> (i32, i32) {
    %c0_i32 = arith.constant 0 : i32
    %c0_i32_0 = arith.constant 0 : i32
    %c0_i32_1 = arith.constant 0 : i32
    return %c0_i32, %c0_i32_0 : i32, i32
  }
}

</mosaic_0001>

<bundles_post_ra>
// kernel: tpu_custom_call.1
= control target key start
LH: loop header
LB: loop body
LE: loop exit
PB: predicated region body
PF: predicated region fallthrough
CT: control target
= control target key end

     0   :  { %9 = vsyncpa [#allocation4], 0  ;;  %s841_s0 = inlined_call_operand.hbm [shape: f32[2,8,9], index: 0, kind: input, shape index: {}]   ;;  %s842_s1 = inlined_call_operand.hbm [shape: f32[8,12], index: 1, kind: input, shape index: {}]   ;;  %s843_s2 = inlined_call_operand.vmem [shape: f32[8,1], index: 2, kind: output, shape index: {0}]   ;;  %s844_s3 = inlined_call_operand.vmem [shape: f32[8,1], index: 3, kind: output, shape index: {1}]  }
   0x1   :  { %11 = vsyncpa [#allocation4 + $0x1], 0 }
   0x2   :  { %12 = vsyncpa [#allocation6], 0  ;;  %s667_s12 = smov 0   ;;  %s669_s13 = smov 0  }
   0x3   :  { %s671_s14 = smov 0   ;;  %s673_s15 = smov 0  }
   0x4 LB: > { %s441_s16 = sadd.s32 4294967295, %s637_s15   ;;  %p38_p0 = scmp.ne.s32.totalorder %s629_s13, %s625_s12  ;;  %s637_s15 = sphi %s673_s15, %s865_s15   ;;  %s633_s14 = sphi %s671_s14, %s864_s14   ;;  %s629_s13 = sphi %s669_s13, %s863_s13   ;;  %s625_s12 = sphi %s667_s12, %s862_s12  }
   0x5   : > { %p687_p1 = scmp.eq.s32.totalorder %s441_s16, 0  ;;  %p442_p2 = scmp.ge.s32.totalorder %s637_s15, 1 }
   0x6   : > { %p112_p3 = scmp.lt.s32.totalorder %s637_s15, 3  ;;  %p693_p4 = scmp.ne.s32.totalorder %s441_s16, 0 }
   0x7   : > { %s849_s17 = scalar_select %p687_p1, 1, 0 }
   0x8   : > { %s850_s18 = scalar_select %p693_p4, 1, 0 }
   0x9   : > { %p699_p5 = por %p687_p1, %p38_p0  ;;  %p703_p6 = pnand %p442_p2, %p112_p3 }
   0xa   : > { %s639_s21 = smov [#allocation5]   ;;  %s710_s23 = sadd.s32 1, %s637_s15  }
   0xb   : > { %s851_s19 = scalar_select %p699_p5, 1, 0 }
   0xc   : > { %s852_s20 = scalar_select %p703_p6, 1, 0 }
   0xd   : > { %s125_s22 = sshll.u32 %s639_s21, 4  ;;  %p491_p7 = pneg %p703_p6  ;;  %s126_s22 = int_to_ptr.vmem [resolvable:$true] %s125_s22 }
   0xe   : > { %s22_s25 = ssub.s32 %s637_s15, %s710_s23  ;;  %s25_s27 = sadd.s32 1, %s633_s14 }
   0xf   : > { %p714_p8 = pnand %p491_p7, %p687_p1  ;;  %p720_p9 = scmp.eq.s32.totalorder %s22_s25, 0 }
  0x10   : > { %s541_s30 = scalar_lea.hbm %s842_s1, 128 }
  0x11   : > { %s854_s26 = scalar_select %p720_p9, 1, 0 }
  0x12   : > { %p542_p11 = scmp.ne.s32.totalorder %s842_s1, %s541_s30  ;;  %p543_p12 = pneg %p714_p8 }
  0x13   : > { %p548_p2 = scmp.lt.u32.totalorder %s541_s30, %s842_s1 }
  0x14   : > { %p544_p13 = pnand %p543_p12, %p542_p11 }
  0x16   : > { %p545_p0 = pneg %p544_p13 }
  0x18   : > { %p550_p3 = pnand %p548_p2, %p545_p0 }
  0x1a   : > { %553 = shalt.err (!%p550_p3)
}
  0x1b   : > { %s554_s8 = scalar_lea.vmem %s126_s22, 128  ;;  %p562_p1 = scmp.lt.s32.totalorder %s126_s22, %s126_s22 }
  0x1c   : > { %p555_p7 = scmp.ne.s32.totalorder %s126_s22, %s554_s8  ;;  %p563_p5 = scmp.lt.s32.totalorder %s554_s8, %s554_s8 }
  0x1e   : > { %p557_p10 = pnand %p555_p7, %p543_p12  ;;  %p564_p6 = por %p563_p5, %p562_p1 }
  0x20   : > { %p558_p4 = pneg %p557_p10 }
  0x22   : > { %p565_p9 = pnand %p564_p6, %p558_p4 }
  0x24   : > { %568 = shalt.err (!%p565_p9)
}
  0x25   : > { %494 = dma.hbm_to_vmem [thread:$0]  (!%p714_p8), %s842_s1, 128, %s126_s22, [#allocation6]  }
  0x26   : > { %p855_p10 = scmp.ne.s32.totalorder %s854_s26, 0  ;;  %p33_p1 = scmp.eq.s32.totalorder %s637_s15, 0 }
  0x27   : > { %p500_p4 = scmp.lt.s32.totalorder %s637_s15, 2  ;;  %s136_s12 = sand.u32 1, %s633_s14  }
  0x28   : > { %s746_s11 = scalar_select %p855_p10, %s633_s14, %s25_s27  }
  0x29   : > { %s446_s16 = sshll.u32 %s637_s15, 7  ;;  %p856_p5 = scmp.ne.s32.totalorder %s633_s14, %s629_s13 }
  0x2a   : > { %s445_s21 = sshll.u32 %s136_s12, 3  ;;  %s758_s28 = scalar_lea.hbm %s841_s0, %s446_s16 }
  0x2b   : > { %p34_p6 = por %p33_p1, %p856_p5  ;;  %s140_s26 = scalar_lea.vmem [#allocation3], %s445_s21 }
  0x2c   : > { %s147_s15 = sshll.u32 %s140_s26, 4  ;;  %s137_s27 = scalar_lea.sflag [#allocation4], %s136_s12  ;;  %s764_s15 = int_to_ptr.vmem [resolvable:$true] %s147_s15 }
  0x2d   : > { %p760_p8 = pnand %p500_p4, %p34_p6  ;;  %s569_s29 = scalar_lea.hbm %s758_s28, 128 }
  0x2e   : > { %p570_p9 = scmp.ne.s32.totalorder %s758_s28, %s569_s29  ;;  %s574_s5 = scalar_lea.hbm %s841_s0, 256 }
  0x2f   : > { %p571_p11 = pneg %p760_p8  ;;  %p575_p0 = scmp.lt.u32.totalorder %s758_s28, %s841_s0 }
  0x30   : > { %p576_p2 = scmp.lt.u32.totalorder %s574_s5, %s569_s29  ;;  %p578_p7 = scmp.lt.u32.totalorder %s569_s29, %s758_s28 }
  0x31   : > { %p572_p12 = pnand %p571_p11, %p570_p9 }
  0x32   : > { %p577_p3 = por %p576_p2, %p575_p0 }
  0x33   : > { %p573_p13 = pneg %p572_p12 }
  0x34   : > { %p579_p10 = por %p578_p7, %p577_p3 }
  0x36   : > { %p580_p1 = pnand %p579_p10, %p573_p13 }
  0x38   : > { %583 = shalt.err (!%p580_p1)
}
  0x39   : > { %s584_s8 = scalar_lea.vmem %s764_s15, 128  ;;  %s640_s9 = smov [#allocation3]  }
  0x3a   : > { %p585_p4 = scmp.ne.s32.totalorder %s764_s15, %s584_s8  ;;  %s589_s10 = sshll.u32 %s640_s9, 4  ;;  %s590_s10 = int_to_ptr.vmem [resolvable:$false] %s589_s10 }
  0x3b   : > { %s591_s12 = scalar_lea.vmem %s590_s10, 256  ;;  %p592_p9 = scmp.lt.s32.totalorder %s764_s15, %s590_s10 }
  0x3c   : > { %p587_p5 = pnand %p585_p4, %p571_p11  ;;  %p593_p12 = scmp.lt.s32.totalorder %s591_s12, %s584_s8 }
  0x3e   : > { %p588_p6 = pneg %p587_p5  ;;  %p594_p0 = por %p593_p12, %p592_p9 }
  0x40   : > { %p595_p2 = pnand %p594_p0, %p588_p6 }
  0x42   : > { %598 = shalt.err (!%p595_p2)
}
  0x43   : > { %498 = dma.hbm_to_vmem [thread:$0]  (!%p760_p8), %s758_s28, 128, %s764_s15, %s137_s27  }
  0x44   : > { %p858_p13 = scmp.ne.s32.totalorder %s852_s20, 0 }
  0x45   : > { %s158_s16 = sand.u32 (!%p858_p13), 1, %s629_s13   ;;  %p859_p11 = scmp.ne.s32.totalorder (!%p858_p13), %s851_s19, 0 }
  0x46   : > { %156 = sbr.rel (%p858_p13) target bundleno = 591 (0x24f), region = 28  ;;  %s448_s21 = sshll.u32 (!%p858_p13), %s158_s16, 3 }
  0x47   : > { %s159_s24 = scalar_lea.sflag (!%p858_p13), [#allocation4], %s158_s16  ;;  %s162_s25 = scalar_lea.vmem (!%p858_p13), [#allocation3], %s448_s21 }
  0x4d   : > { %616 = dma.done.wait (%p859_p11), %s159_s24, 128  }
  0x4e   : > { %618 = vsyncadd (%p859_p11), %s159_s24, 4294967168  ;;  %p860_p3 = scmp.ne.s32.totalorder %s849_s17, 0 }
  0x50   : > { %620 = dma.done.wait (%p860_p3), [#allocation6], 128  }
  0x51   : > { %622 = vsyncadd (%p860_p3), [#allocation6], 4294967168  ;;  %p861_p8 = scmp.ne.s32.totalorder %s850_s18, 0 }
  0x52   : > { %vm188_vm0 = vcmask (!%p861_p8), 7168   ;;  %v641_v0 = vmov (!%p861_p8), 0.0  }
  0x53   : > { %187 = sbr.rel (%p861_p8) target bundleno = 90 (0x5a), region = 40  ;;  %189 = vst.msk [vmem:[%s843_s2] sm:$0xff] (!%p861_p8), %vm188_vm0, %v641_v0  ;;  %190 = vst.msk [vmem:[%s844_s3] sm:$0xff] (!%p861_p8), %vm188_vm0, %v641_v0 }
  0x5a PF: > { %v191_v1 = vld [vmem:[%s162_s25] sm:$0xff]  ;;  %vm193_vm1 = vcmask 60416   ;;  %vm195_vm2 = vcmask 64516   ;;  %s642_s19 = smov 127   ;;  %v643_v2 = vmov 0.0|0.0   ;;  %vm644_vm3 = vmmov 0  }
  0x5b   : > { %198 = vrot.lane.b32.xlu0 %v191_v1, %s642_s19  ;;  %194 = vst.msk [vmem:[#allocation2] sm:$0xf] %vm193_vm1, %v191_v1  ;;  %477 = vmatprep.subr.bf16.mxu0 %v643_v2  ;;  %v645_v3 = vmov 0.0   ;;  %vm208_vm4 = vcmask 1043456   ;;  %vm646_vm5 = vmmov 1   ;;  %v192_v8 = vld [vmem:[#allocation5] sm:$0xff] }
  0x5c   : > { %196 = vst.msk [vmem:[#allocation2] sm:$0xf0] %vm195_vm2, %v191_v1  ;;  %467 = vmatprep.mubr.msk.f32.mxu0 %vm644_vm3, %v645_v3  ;;  %481 = vmatprep.subr.bf16.mxu1 %v643_v2  ;;  %vm479_vm6 = vmpackc.low %vm208_vm4, %vm646_vm5  ;;  %vm204_vm7 = vcmask 97280   ;;  %vm282_vm8 = vcmask 64512   ;;  %v379_v24 = vld [vmem:[%s843_s2] sm:$0xff]  ;;  %vm381_vm9 = vcmask 7168  }
  0x5d   : > { %474 = vmatprep.mubr.msk.f32.mxu1 %vm644_vm3, %v645_v3  ;;  %v383_v28 = vld [vmem:[%s844_s3] sm:$0xff] }
  0x63   : > { %v202_v4 = vld [vmem:[#allocation2] sm:$0xff] }
  0x64   : > { %292 = vst.msk [vmem:[#allocation2 - $0x4] sm:$0xf0] %vm195_vm2, %v191_v1 }
  0xcd   : > { %v199_v5 = vpop.permute.xlu0 %198 }
  0xce   : > { %201 = vst.msk [vmem:[#allocation2 + $0x8] sm:$0xf] %vm193_vm1, %v199_v5  ;;  %293 = vst.msk [vmem:[#allocation2 + $0x4] sm:$0xf] %vm193_vm1, %v199_v5 }
  0xd5   : > { %v203_v6 = vld [vmem:[#allocation2 + $0x8] sm:$0xf]  ;;  %v295_v9 = vld [vmem:[#allocation2] sm:$0xff] }
  0xd6   : > { %294 = vst.msk [vmem:[#allocation2 + $0x4] sm:$0xf0] %vm195_vm2, %v199_v5  ;;  %v478_v7 = vpack.c.bf16 %v203_v6, %v202_v4 }
  0xd8   : > { %480 = vmatpush3.bf16.msk.msra.mxu0 %vm479_vm6, %v478_v7 }
  0xdb   : > { %468 = vmatmul.mubr.msk.f32.vlgmr.msra.gmra.mrb[0].mxu0 %vm204_vm7, %v192_v8 }
  0xdd   : > { %v296_v10 = vld [vmem:[#allocation2 + $0x8] sm:$0xf] }
  0xde   : > { %v482_v11 = vpack.c.bf16 %v296_v10, %v295_v9 }
  0xe0   : > { %484 = vmatpush3.bf16.msk.msra.mxu1 %vm479_vm6, %v482_v11 }
  0xe3   : > { %475 = vmatmul.mubr.msk.f32.vlgmr.msra.gmra.mrb[0].mxu1 %vm204_vm7, %v192_v8 }
 0x1ae   : > { %v278_v12 = vpop.f32.mrb[0].mxu0 }
 0x1af   : > { %v469_v13 = vpop.f32.mrb[1].mxu0  ;;  %v283_v14 = vsel %vm282_vm8, %v278_v12, 0.0  ;;  %v287_v15 = vmul.f32 %v278_v12, %v278_v12 }
 0x1b0   : > { %284 = vadd.xlane.f32.xlu0 %v283_v14 }
 0x1b1   : > { %v288_v16 = vsel %vm282_vm8, %v287_v15, 0.0 }
 0x1b2   : > { %289 = vadd.xlane.f32.xlu1 %v288_v16 }
 0x1b6   : > { %v366_v17 = vpop.f32.mrb[0].mxu1 }
 0x1b7   : > { %v374_v18 = vmul.f32 %v366_v17, %v366_v17  ;;  %v476_v19 = vpop.f32.mrb[1].mxu1  ;;  %v370_v20 = vsel %vm282_vm8, %v366_v17, 0.0 }
 0x1b8   : > { %371 = vadd.xlane.f32.xlu1 %v370_v20 }
 0x1b9   : > { %v375_v21 = vsel %vm282_vm8, %v374_v18, 0.0 }
 0x1bc   : > { %376 = vadd.xlane.f32.xlu1 %v375_v21 }
 0x23d   : > { %v285_v23 = vpop.xlane.xlu0 %284 }
 0x23f   : > { %v290_v22 = vpop.xlane.xlu1 %289 }
 0x245   : > { %v372_v25 = vpop.xlane.xlu1 %371 }
 0x246   : > { %v373_v26 = vadd.f32 %v372_v25, %v285_v23 }
 0x248   : > { %v380_v27 = vadd.f32 %v379_v24, %v373_v26 }
 0x249   : > { %v377_v29 = vpop.xlane.xlu1 %376 }
 0x24a   : > { %382 = vst.msk [vmem:[%s843_s2] sm:$0xff] %vm381_vm9, %v380_v27  ;;  %v378_v30 = vadd.f32 %v377_v29, %v290_v22 }
 0x24c   : > { %v384_v31 = vadd.f32 %v383_v28, %v378_v30 }
 0x24e   : > { %385 = vst.msk [vmem:[%s844_s3] sm:$0xff] %vm381_vm9, %v384_v31 }
 0x24f PF: > { %p15_p7 = scmp.ge.s32.totalorder %s710_s23, 4   ;;  %s862_s12 = smov %s629_s13 }
 0x250   : > { %s863_s13 = smov %s633_s14  ;;  %s864_s14 = smov %s746_s11 }
 0x251   : > { %s865_s15 = smov %s710_s23  ;;  %17 = sbr.rel (!%p15_p7) target bundleno = 4 (0x4), region = 80 }
 0x258   :  { %403 = vsyncpa [#allocation4], 1 }
 0x259   :  { %405 = vsyncpa [#allocation4 + $0x1], 1 }
 0x25a   :  { %406 = vsyncpa [#allocation6], 1 }

</bundles_post_ra>
